<compile_context>
chip_gen: v7x
topology: tpu7x:2x2x1
jax: 0.10.0
libtpu: 0.0.40
codegen_flags: <defaults>
</compile_context>

<pallas_src>
import jax
import jax.numpy as jnp
from jax.experimental import pallas as pl
from jax.experimental.pallas import tpu as pltpu


# ~16 MiB planned working set: leaves headroom under v7x's 32 MiB scoped VMEM
# default (64 MiB physical per TC) and is far under v5e/v6e's 128 MiB.
_VMEM_BUDGET = 16 * 1024 * 1024


def _round_up(x, m):
    return (x + m - 1) // m * m


def _divisors_mult_128(hp):
    """Divisors of hp that are multiples of 128, descending."""
    return [c for c in range(hp, 127, -128) if hp % c == 0]


def _plan_tiles(bp, hp, itemsize, vmem_budget):
    """Pick (tn, tk).  tk == hp means the full-K (no reduction axis) kernel."""
    cands = _divisors_mult_128(hp)
    # Prefer >=2 N tiles so the "parallel" axis can shard across v7x's 2 TCs.
    n_pref = [c for c in cands if hp // c >= 2] or cands
    # Conservative fixed VMEM bytes: resident x + double-buffered out + bias.
    fixed = bp * hp * itemsize + 2 * bp * n_pref[0] * 4 + 2 * n_pref[0] * 4
    # Full-K path: double-buffered (hp, tn) weight tile must fit the budget.
    for tn in n_pref:
        if 2 * hp * tn * itemsize + fixed <= vmem_budget:
            return tn, hp
    # K-tiled fallback for very large H: smallest preferred tn, largest tk
    # whose double-buffered weight tile fits.
    tn = n_pref[-1]
    for tk in cands:
        if 2 * tk * tn * itemsize + fixed <= vmem_budget:
            return tn, tk
    return 128, 128


def _pooler_kernel_fullk(x_ref, w_ref, b_ref, o_ref):
    # x_ref: (Bp, Kp) resident CLS activations
    # w_ref: (Kp, tn) weight tile, (in, out) layout -> plain matmul, no transpose
    # b_ref: (1, tn)  bias tile (f32)
    # o_ref: (Bp, tn) output tile
    y = jnp.dot(x_ref[...], w_ref[...], preferred_element_type=jnp.float32)
    o_ref[...] = jnp.tanh(y + b_ref[...].astype(jnp.float32)).astype(o_ref.dtype)


def _pooler_kernel_ktiled(x_ref, w_ref, b_ref, o_ref, acc_ref):
    # Fallback for very large H: K is tiled, f32 accumulator in VMEM scratch.
    # x_ref stays fully resident; the K slice is taken in-kernel.
    k = pl.program_id(1)
    tk = w_ref.shape[0]

    @pl.when(k == 0)
    def _():
        acc_ref[...] = jnp.zeros_like(acc_ref)

    kk = pl.multiple_of(k * tk, 128)
    acc_ref[...] += jnp.dot(
        x_ref[:, pl.ds(kk, tk)], w_ref[...],
        preferred_element_type=jnp.float32)

    @pl.when(k == pl.num_programs(1) - 1)
    def _():
        y = acc_ref[...] + b_ref[...].astype(jnp.float32)
        o_ref[...] = jnp.tanh(y).astype(o_ref.dtype)


def prepare_bert_pooler_params(weight, bias, *, compute_dtype=None):
    """One-time weight/bias preparation.  Persist the result outside the hot path.

    weight: (H_out, H_in) nn.Linear layout; bias: (H_out,).
    Returns (w_prepared, bias_prepared):
      w_prepared:   (Kp, Np) = padded W.T in (in, out) layout, compute dtype
      bias_prepared:(1, Np)  f32
    The cast / transpose / pad each copy W once here instead of on every call.
    """
    h_out, h_in = weight.shape
    dtype = compute_dtype if compute_dtype is not None else weight.dtype
    kp = _round_up(h_in, 128)
    np_ = _round_up(h_out, 128)
    w = weight.astype(dtype).T                      # (in, out)
    if kp != h_in or np_ != h_out:
        w = jnp.pad(w, ((0, kp - h_in), (0, np_ - h_out)))
        bias = jnp.pad(bias, (0, np_ - h_out))
    b2d = bias.reshape(1, np_).astype(jnp.float32)
    return w, b2d


def bert_pooler(hidden_states, w_prepared, bias_prepared, *,
                vmem_budget=_VMEM_BUDGET):
    """hidden_states: (B, S, H); prepared params from prepare_bert_pooler_params.

    Returns (B, H) = tanh(hidden_states[:, 0] @ W.T + b) in hidden_states.dtype.
    """
    B, S, H = hidden_states.shape
    out_dtype = hidden_states.dtype
    kp, np_ = w_prepared.shape
    itemsize = jnp.dtype(w_prepared.dtype).itemsize

    # Slice the CLS token before the pallas_call: only B*H elements move.
    x = hidden_states[:, 0, :].astype(w_prepared.dtype)
    bp = max(8, _round_up(B, 8))
    if bp != B or kp != H:
        x = jnp.pad(x, ((0, bp - B), (0, kp - H)))

    tn, tk = _plan_tiles(bp, kp, itemsize, vmem_budget)

    cost = pl.CostEstimate(
        flops=2 * bp * kp * np_,
        transcendentals=bp * np_,
        bytes_accessed=(kp * np_ * itemsize + bp * kp * itemsize
                        + bp * np_ * jnp.dtype(out_dtype).itemsize + np_ * 4))

    common = dict(
        out_shape=jax.ShapeDtypeStruct((bp, np_), out_dtype),
        compiler_params=pltpu.CompilerParams(
            dimension_semantics=("parallel",) if tk == kp
            else ("parallel", "arbitrary"),
            vmem_limit_bytes=32 * 1024 * 1024),
        cost_estimate=cost,
    )

    if tk == kp:
        # Single grid axis over output columns; full-K contraction per step.
        grid_spec = pltpu.PrefetchScalarGridSpec(
            num_scalar_prefetch=0,
            grid=(np_ // tn,),
            in_specs=[
                pl.BlockSpec((bp, kp), lambda j: (0, 0)),   # x resident
                pl.BlockSpec((kp, tn), lambda j: (0, j)),   # weight column tile
                pl.BlockSpec((1, tn), lambda j: (0, j)),    # bias tile
            ],
            out_specs=pl.BlockSpec((bp, tn), lambda j: (0, j)),
        )
        out_padded = pl.pallas_call(_pooler_kernel_fullk, grid_spec=grid_spec,
                                    **common)(x, w_prepared, bias_prepared)
    else:
        # K-tiled fallback (reduction axis last, f32 accumulator scratch).
        grid_spec = pltpu.PrefetchScalarGridSpec(
            num_scalar_prefetch=0,
            grid=(np_ // tn, kp // tk),
            in_specs=[
                pl.BlockSpec((bp, kp), lambda j, k: (0, 0)),   # x resident
                pl.BlockSpec((tk, tn), lambda j, k: (k, j)),   # weight tile
                pl.BlockSpec((1, tn), lambda j, k: (0, j)),    # bias tile
            ],
            out_specs=pl.BlockSpec((bp, tn), lambda j, k: (0, j)),
            scratch_shapes=[pltpu.VMEM((bp, tn), jnp.float32)],
        )
        out_padded = pl.pallas_call(_pooler_kernel_ktiled, grid_spec=grid_spec,
                                    **common)(x, w_prepared, bias_prepared)

    return out_padded[:B, :H]


if __name__ == "__main__":
    B, S, H = 2, 8, 32  # small shapes: batch=2, seq=8, hidden=32

    key = jax.random.PRNGKey(0)
    k_h, k_w, k_b, k_h2, k_w2, k_b2 = jax.random.split(key, 6)

    hidden_states = jax.random.normal(k_h, (B, S, H), dtype=jnp.float32)
    # Deterministic "nn.Linear(hidden_size, hidden_size)" parameters.
    bound = 1.0 / (H ** 0.5)
    weight = jax.random.uniform(k_w, (H, H), jnp.float32, -bound, bound)
    bias = jax.random.uniform(k_b, (H,), jnp.float32, -bound, bound)

    ref = jnp.tanh(hidden_states[:, 0] @ weight.T + bias)

    # f32 path (prepare params once; full-K single-axis grid).
    w_f32, b_f32 = prepare_bert_pooler_params(weight, bias)
    out = bert_pooler(hidden_states, w_f32, b_f32)
    jax.block_until_ready(out)
    assert out.shape == (B, H)
    assert jnp.allclose(out, ref, atol=1e-5, rtol=1e-5)

    # bf16 weight-streaming path: weights persisted in bf16 (one-time cast),
    # f32 accumulate / epilogue.  Looser tolerance for bf16 input rounding.
    # TODO(synk): re-validate bf16 tolerance at production H (768/1024) before
    # defaulting bf16 on; error grows ~sqrt(H).
    w_bf16, b_bf16 = prepare_bert_pooler_params(
        weight, bias, compute_dtype=jnp.bfloat16)
    out_bf16 = bert_pooler(hidden_states, w_bf16, b_bf16)
    jax.block_until_ready(out_bf16)
    assert jnp.allclose(out_bf16, ref, atol=2e-2, rtol=2e-2)

    # Exercise the K-tiled fallback (used for very large H / tight v7x VMEM)
    # by shrinking the VMEM budget at H=256 so planning picks tk < Hp.
    H2 = 256
    hs2 = jax.random.normal(k_h2, (B, S, H2), dtype=jnp.float32)
    bound2 = 1.0 / (H2 ** 0.5)
    weight2 = jax.random.uniform(k_w2, (H2, H2), jnp.float32, -bound2, bound2)
    bias2 = jax.random.uniform(k_b2, (H2,), jnp.float32, -bound2, bound2)
    w2, b2 = prepare_bert_pooler_params(weight2, bias2)
    out2 = bert_pooler(hs2, w2, b2, vmem_budget=200 * 1024)
    jax.block_until_ready(out2)
    ref2 = jnp.tanh(hs2[:, 0] @ weight2.T + bias2)
    assert jnp.allclose(out2, ref2, atol=1e-5, rtol=1e-5)

    print("KERNEL_OK")
</pallas_src>

<mosaic_0001>
module attributes {stable_mosaic.version = 11 : i64} {
  func.func @_pooler_kernel_fullk(%arg0: i32, %arg1: memref<8x128xf32, #tpu.memory_space<vmem>>, %arg2: memref<128x128xf32, #tpu.memory_space<vmem>>, %arg3: memref<1x128xf32, #tpu.memory_space<vmem>>, %arg4: memref<8x128xf32, #tpu.memory_space<vmem>>) attributes {dimension_semantics = [#tpu.dimension_semantics<parallel>], iteration_bounds = array<i64: 1>, scalar_prefetch = 0 : i64, scratch_operands = 0 : i64, tpu.core_type = #tpu.core_type<tc>, window_params = [{pipeline_mode = #tpu.pipeline_mode<synchronous>, transform_indices = @transform_0, window_bounds = array<i64: 8, 128>}, {transform_indices = @transform_1, window_bounds = array<i64: 128, 128>}, {transform_indices = @transform_2, window_bounds = array<i64: 1, 128>}, {transform_indices = @transform_3, window_bounds = array<i64: 8, 128>}]} {
    %c0 = arith.constant 0 : index
    %c0_0 = arith.constant 0 : index
    %0 = vector.load %arg1[%c0, %c0_0] : memref<8x128xf32, #tpu.memory_space<vmem>>, vector<8x128xf32>
    %c0_1 = arith.constant 0 : index
    %c0_2 = arith.constant 0 : index
    %1 = vector.load %arg2[%c0_1, %c0_2] : memref<128x128xf32, #tpu.memory_space<vmem>>, vector<128x128xf32>
    %cst = arith.constant dense<0.000000e+00> : vector<8x128xf32>
    %2 = tpu.matmul %0, %1, %cst {dimension_numbers = #tpu.dot_dimension_numbers<[1], [0], [0], [1], [0, 0, 1, 1], [], []>} : vector<8x128xf32>, vector<128x128xf32>, vector<8x128xf32> -> vector<8x128xf32>
    %c0_3 = arith.constant 0 : index
    %c0_4 = arith.constant 0 : index
    %3 = vector.load %arg3[%c0_3, %c0_4] : memref<1x128xf32, #tpu.memory_space<vmem>>, vector<1x128xf32>
    %4 = vector.broadcast %3 : vector<1x128xf32> to vector<8x128xf32>
    %5 = arith.addf %2, %4 : vector<8x128xf32>
    %6 = math.tanh %5 : vector<8x128xf32>
    %c0_5 = arith.constant 0 : index
    %c0_6 = arith.constant 0 : index
    %7 = vector.load %arg4[%c0_5, %c0_6] : memref<8x128xf32, #tpu.memory_space<vmem>>, vector<8x128xf32>
    tpu.vector_store %arg4[%c0_5, %c0_6], %6 {strides = array<i32>} : memref<8x128xf32, #tpu.memory_space<vmem>>, vector<8x128xf32>,
    return
  }
  func.func @transform_0(%arg0: i32) -> (i32, i32) {
    %c0_i32 = arith.constant 0 : i32
    %c0_i32_0 = arith.constant 0 : i32
    %c0_i32_1 = arith.constant 0 : i32
    return %c0_i32, %c0_i32_0 : i32, i32
  }
  func.func @transform_1(%arg0: i32) -> (i32, i32) {
    %c0_i32 = arith.constant 0 : i32
    %c0_i32_0 = arith.constant 0 : i32
    return %c0_i32, %arg0 : i32, i32
  }
  func.func @transform_2(%arg0: i32) -> (i32, i32) {
    %c0_i32 = arith.constant 0 : i32
    %c0_i32_0 = arith.constant 0 : i32
    return %c0_i32, %arg0 : i32, i32
  }
  func.func @transform_3(%arg0: i32) -> (i32, i32) {
    %c0_i32 = arith.constant 0 : i32
    %c0_i32_0 = arith.constant 0 : i32
    return %c0_i32, %arg0 : i32, i32
  }
}

</mosaic_0001>

<bundles_post_ra>
// kernel: tpu_custom_call.1
= control target key start
LH: loop header
LB: loop body
LE: loop exit
PB: predicated region body
PF: predicated region fallthrough
CT: control target
= control target key end

     0   :  { %8 = vsyncpa [#allocation3], 0  ;;  %s386_s0 = inlined_call_operand.hbm [shape: f32[8,128], index: 0, kind: input, shape index: {}]   ;;  %s387_s1 = inlined_call_operand.hbm [shape: f32[128,128], index: 1, kind: input, shape index: {}]   ;;  %s388_s2 = inlined_call_operand.vmem [shape: f32[1,128], index: 2, kind: input, shape index: {}]   ;;  %s389_s3 = inlined_call_operand.hbm [shape: f32[8,128], index: 3, kind: output, shape index: {}]  }
   0x1   :  { %9 = vsyncpa [#allocation6], 0 }
   0x2   :  { %10 = vsyncpa [#allocation4], 0  ;;  %s312_s12 = smov [#allocation2]   ;;  %s313_s14 = smov [#allocation5]  }
   0x3   :  { %s17_s13 = sshll.u32 %s312_s12, 4  ;;  %s26_s15 = sshll.u32 %s313_s14, 4  ;;  %s18_s13 = int_to_ptr.vmem [resolvable:$true] %s17_s13  ;;  %s340_s15 = int_to_ptr.vmem [resolvable:$true] %s26_s15 }
   0x4   :  { %s240_s18 = scalar_lea.hbm %s386_s0, 128 }
   0x5   :  { %p241_p0 = scmp.ne.s32.totalorder %s386_s0, %s240_s18  ;;  %p244_p1 = scmp.lt.u32.totalorder %s240_s18, %s386_s0 }
   0x7   :  { %p246_p2 = pnand %p244_p1, %p241_p0 }
   0x9   :  { %249 = shalt.err (!%p246_p2)
}
   0xa   :  { %s250_s23 = scalar_lea.vmem %s18_s13, 128  ;;  %p255_p4 = scmp.lt.s32.totalorder %s18_s13, %s18_s13 }
   0xb   :  { %p251_p3 = scmp.ne.s32.totalorder %s18_s13, %s250_s23  ;;  %p256_p5 = scmp.lt.s32.totalorder %s250_s23, %s250_s23 }
   0xd   :  { %p257_p6 = por %p256_p5, %p255_p4 }
   0xf   :  { %p258_p7 = pnand %p257_p6, %p251_p3 }
  0x11   :  { %261 = shalt.err (!%p258_p7)
}
  0x12   :  { %20 = dma.hbm_to_vmem [thread:$0]  %s386_s0, 128, %s18_s13, [#allocation3]  }
  0x13   :  { %s262_s28 = scalar_lea.hbm %s387_s1, 2048 }
  0x14   :  { %p263_p8 = scmp.ne.s32.totalorder %s387_s1, %s262_s28  ;;  %p266_p9 = scmp.lt.u32.totalorder %s262_s28, %s387_s1 }
  0x16   :  { %p268_p10 = pnand %p266_p9, %p263_p8 }
  0x18   :  { %271 = shalt.err (!%p268_p10)
}
  0x19   :  { %s272_s6 = scalar_lea.vmem %s340_s15, 2048  ;;  %p277_p12 = scmp.lt.s32.totalorder %s340_s15, %s340_s15 }
  0x1a   :  { %p273_p11 = scmp.ne.s32.totalorder %s340_s15, %s272_s6  ;;  %p278_p13 = scmp.lt.s32.totalorder %s272_s6, %s272_s6 }
  0x1c   :  { %p279_p0 = por %p278_p13, %p277_p12 }
  0x1e   :  { %p280_p1 = pnand %p279_p0, %p273_p11 }
  0x20   :  { %283 = shalt.err (!%p280_p1)
}
  0x21   :  { %s314_s0 = smov 128   ;;  %s315_s7 = smov 8  }
  0x22   :  { %32 = dma.hbm_to_vmem [thread:$0]  %s387_s1, 2048, %s340_s15, [#allocation6], %s314_s0, %s314_s0, %s315_s7  }
  0x23   :  { %306 = dma.done.wait [#allocation3], 128  }
  0x24   :  { %307 = vsyncadd [#allocation3], 4294967168 }
  0x25   :  { %308 = dma.done.wait [#allocation6], 2048  }
  0x26   :  { %309 = vsyncadd [#allocation6], 4294965248  ;;  %v316_v0 = vmov 0.0|0.0   ;;  %vm317_vm0 = vmmov 0   ;;  %v318_v1 = vmov 0.0   ;;  %v42_v2 = vld [vmem:[#allocation5] sm:$0xff] }
  0x27   :  { %206 = vmatprep.subr.bf16.mxu0 %v316_v0  ;;  %203 = vmatprep.mubr.msk.f32.mxu0 %vm317_vm0, %v318_v1  ;;  %v43_v3 = vld [vmem:[#allocation5 + $0x8] sm:$0xff]  ;;  %v44_v4 = vld [vmem:[#allocation5 + $0x10] sm:$0xff]  ;;  %v45_v6 = vld [vmem:[#allocation5 + $0x18] sm:$0xff]  ;;  %s319_s11 = smov [#allocation7]  }
  0x28   :  { %v207_v5 = vpack.c.bf16 %v43_v3, %v42_v2  ;;  %v210_v7 = vpack.c.bf16 %v45_v6, %v44_v4  ;;  %v46_v8 = vld [vmem:[#allocation5 + $0x20] sm:$0xff]  ;;  %v47_v9 = vld [vmem:[#allocation5 + $0x28] sm:$0xff]  ;;  %v48_v11 = vld [vmem:[#allocation5 + $0x30] sm:$0xff]  ;;  %s143_s12 = sshll.u32 %s319_s11, 4  ;;  %s144_s12 = int_to_ptr.vmem [resolvable:$true] %s143_s12 }
  0x29   :  { %v213_v10 = vpack.c.bf16 %v47_v9, %v46_v8  ;;  %v49_v12 = vld [vmem:[#allocation5 + $0x38] sm:$0xff]  ;;  %v50_v14 = vld [vmem:[#allocation5 + $0x40] sm:$0xff]  ;;  %v51_v15 = vld [vmem:[#allocation5 + $0x48] sm:$0xff]  ;;  %s284_s13 = scalar_lea.vmem %s144_s12, 128  ;;  %p289_p3 = scmp.lt.s32.totalorder %s144_s12, %s144_s12 }
  0x2a   :  { %208 = vmatpush3.bf16.msra.mxu0 %v207_v5  ;;  %v216_v13 = vpack.c.bf16 %v49_v12, %v48_v11  ;;  %v219_v16 = vpack.c.bf16 %v51_v15, %v50_v14  ;;  %v52_v17 = vld [vmem:[#allocation5 + $0x50] sm:$0xff]  ;;  %v53_v18 = vld [vmem:[#allocation5 + $0x58] sm:$0xff]  ;;  %v54_v20 = vld [vmem:[#allocation5 + $0x60] sm:$0xff]  ;;  %p285_p2 = scmp.ne.s32.totalorder %s144_s12, %s284_s13  ;;  %p290_p4 = scmp.lt.s32.totalorder %s284_s13, %s284_s13 }
  0x2b   :  { %209 = vmatprep.subr.bf16.mxu0 %v316_v0  ;;  %v222_v19 = vpack.c.bf16 %v53_v18, %v52_v17  ;;  %v55_v21 = vld [vmem:[#allocation5 + $0x68] sm:$0xff]  ;;  %v56_v23 = vld [vmem:[#allocation5 + $0x70] sm:$0xff]  ;;  %v57_v24 = vld [vmem:[#allocation5 + $0x78] sm:$0xff] }
  0x2c   :  { %v225_v22 = vpack.c.bf16 %v55_v21, %v54_v20  ;;  %v228_v25 = vpack.c.bf16 %v57_v24, %v56_v23  ;;  %v41_v26 = vld [vmem:[#allocation2] sm:$0xff]  ;;  %p291_p5 = por %p290_p4, %p289_p3 }
  0x2d   :  { %v153_v27 = vld [vmem:[%s388_s2] ss:$0 sm:$0xff] }
  0x2e   :  { %211 = vmatpush3.bf16.msra.mxu0 %v210_v7  ;;  %p292_p6 = pnand %p291_p5, %p285_p2 }
  0x2f   :  { %212 = vmatprep.subr.bf16.mxu0 %v316_v0 }
  0x32   :  { %214 = vmatpush3.bf16.msra.mxu0 %v213_v10 }
  0x33   :  { %215 = vmatprep.subr.bf16.mxu0 %v316_v0 }
  0x36   :  { %217 = vmatpush3.bf16.msra.mxu0 %v216_v13 }
  0x37   :  { %218 = vmatprep.subr.bf16.mxu0 %v316_v0 }
  0x3a   :  { %220 = vmatpush3.bf16.msra.mxu0 %v219_v16 }
  0x3b   :  { %221 = vmatprep.subr.bf16.mxu0 %v316_v0 }
  0x3e   :  { %223 = vmatpush3.bf16.msra.mxu0 %v222_v19 }
  0x3f   :  { %224 = vmatprep.subr.bf16.mxu0 %v316_v0 }
  0x42   :  { %226 = vmatpush3.bf16.msra.mxu0 %v225_v22 }
  0x43   :  { %227 = vmatprep.subr.bf16.mxu0 %v316_v0 }
  0x46   :  { %229 = vmatpush3.bf16.msra.mxu0 %v228_v25 }
  0x49   :  { %204 = vmatmul.mubr.f32.vlgmr.msra.gmra.mrb[0].mxu0 %v41_v26 }
 0x11c   :  { %v131_v28 = vpop.f32.mrb[0].mxu0 }
 0x11d   :  { %v132_v29 = vadd.f32 %v153_v27, %v131_v28  ;;  %v205_v30 = vpop.f32.mrb[1].mxu0 }
 0x11f   :  { %238 = vtanh.f32 %v132_v29 }
 0x129   :  { %v239_v31 = vpop.eup %238 }
 0x12a   :  { %136 = vst [vmem:[#allocation7] sm:$0xff] %v239_v31 }
 0x12b   :  { %295 = shalt.err (!%p292_p6)
}
 0x12c   :  { %s296_s2 = scalar_lea.hbm %s389_s3, 128 }
 0x12d   :  { %p297_p7 = scmp.ne.s32.totalorder %s389_s3, %s296_s2  ;;  %p300_p8 = scmp.lt.u32.totalorder %s296_s2, %s389_s3 }
 0x12f   :  { %p302_p9 = pnand %p300_p8, %p297_p7 }
 0x131   :  { %305 = shalt.err (!%p302_p9)
}
 0x132   :  { %146 = dma.vmem_to_hbm [thread:$0]  %s144_s12, 128, %s389_s3, [#allocation4]  }
 0x133   :  { %310 = dma.done.wait [#allocation4], 128  }
 0x134   :  { %311 = vsyncadd [#allocation4], 4294967168 }
 0x135   :  { %150 = vsyncpa [#allocation3], 1 }
 0x136   :  { %151 = vsyncpa [#allocation6], 1 }
 0x137   :  { %152 = vsyncpa [#allocation4], 1 }

</bundles_post_ra>
